<compile_context>
chip_gen: v7x
topology: tpu7x:2x2x1
jax: 0.10.0
libtpu: 0.0.40
codegen_flags: <defaults>
</compile_context>

<pallas_src>
import jax
import jax.numpy as jnp
from jax.experimental import pallas as pl
from jax.experimental.pallas import tpu as pltpu


def _classhead_kernel(x_ref, w_ref, b_ref, o_ref):
    # x_ref: (1, C_in, t)    one pixel-tile of the NCHW activation
    # w_ref: (C_out, C_in)   1x1 conv weight (resident, constant index map)
    # b_ref: (C_out, 1)      bias in f32, broadcast over pixels
    # o_ref: (1, C_out, t)   lane-dense output tile
    acc = jnp.dot(w_ref[...], x_ref[0], preferred_element_type=jnp.float32)
    o_ref[0] = (acc + b_ref[...]).astype(o_ref.dtype)


def classhead_conv1x1_nchw(x3, w_mat, bias_f32, *, tile_hw=2048):
    """1x1 conv as a per-pixel matmul, NCHW-native.

    x3       : (N, C_in, HW)  activation (f32 or bf16), NCHW with H,W flattened
    w_mat    : (C_out, C_in)  weight in the activation dtype
    bias_f32 : (C_out, 1)     bias in float32
    returns  : (N, C_out, HW) in the activation dtype
    """
    N, C_in, HW = x3.shape
    C_out = w_mat.shape[0]
    assert tile_hw % 128 == 0, "tile_hw must be a multiple of 128"

    # Biggest lane-dense pixel tile that fits; full HW extent is always legal.
    t = HW if HW <= tile_hw else tile_hw
    n_hw_tiles = pl.cdiv(HW, t)
    grid = (n_hw_tiles, N)            # HW tiles leading -> megacore-friendly at N=1

    itemsize = jnp.dtype(x3.dtype).itemsize
    co_pad = max(8, ((C_out + 7) // 8) * 8)

    # Per-step VMEM: double-buffered x/out tiles + (small) resident weight/bias.
    step_bytes = 2 * (C_in * t * itemsize        # x tile
                      + co_pad * t * itemsize    # out tile
                      + C_out * C_in * itemsize  # weight
                      + co_pad * 128 * 4)        # bias (lane-padded, f32)
    vmem_limit = None
    if step_bytes > (14 << 20):       # v5e's default scoped limit is 16 MiB
        vmem_limit = int(min(step_bytes + (8 << 20), 48 << 20))

    cost = pl.CostEstimate(
        flops=2 * N * HW * C_in * C_out,
        transcendentals=0,
        bytes_accessed=int(N * C_in * HW * itemsize       # activation read (dominant)
                           + C_out * C_in * itemsize      # weight read
                           + N * C_out * HW * itemsize),  # output write
    )

    return pl.pallas_call(
        _classhead_kernel,
        out_shape=jax.ShapeDtypeStruct((N, C_out, HW), x3.dtype),
        grid_spec=pltpu.PrefetchScalarGridSpec(
            num_scalar_prefetch=0,
            grid=grid,
            in_specs=[
                pl.BlockSpec((1, C_in, t), lambda j, n: (n, 0, j)),
                pl.BlockSpec((C_out, C_in), lambda j, n: (0, 0)),
                pl.BlockSpec((C_out, 1), lambda j, n: (0, 0)),
            ],
            out_specs=pl.BlockSpec((1, C_out, t), lambda j, n: (n, 0, j)),
        ),
        compiler_params=pltpu.CompilerParams(
            dimension_semantics=("parallel", "parallel"),
            vmem_limit_bytes=vmem_limit,
        ),
        cost_estimate=cost,
    )(x3, w_mat, bias_f32)


def class_head_forward(x_nchw, conv_w, conv_b, num_anchors, *, tile_hw=2048):
    """Full ClassHead forward.

    x_nchw : (N, C_in, H, W)          f32 or bf16
    conv_w : (C_out, C_in, 1, 1)      PyTorch Conv2d weight layout
    conv_b : (C_out,)
    returns (N, H*W*num_anchors, 2)   in x_nchw's dtype
    """
    N, C_in, H, W = x_nchw.shape
    C_out = conv_w.shape[0]
    assert C_out == num_anchors * 2

    x3 = x_nchw.reshape(N, C_in, H * W)                       # free: NCHW is (N,C,HW)
    w_mat = conv_w.reshape(C_out, C_in).astype(x_nchw.dtype)  # MXU-friendly dtype
    b_f32 = conv_b.astype(jnp.float32).reshape(C_out, 1)      # bias add stays f32

    out3 = classhead_conv1x1_nchw(x3, w_mat, b_f32, tile_hw=tile_hw)  # (N,C_out,HW)

    # Cheap fix-up on the tiny output (C_out = 2*num_anchors channels/pixel),
    # matching PyTorch's permute(0,2,3,1).contiguous().view(N, -1, 2).
    out_nhwc = jnp.transpose(out3, (0, 2, 1))                 # (N, HW, C_out)
    return out_nhwc.reshape(N, H * W * num_anchors, 2)


def _reference(x, conv_w, conv_b, num_anchors):
    N, C_in, H, W = x.shape
    c_out = conv_w.shape[0]
    ref = jnp.einsum(
        "nchw,oc->nhwo",
        x.astype(jnp.float32),
        conv_w.reshape(c_out, C_in).astype(jnp.float32),
    ) + conv_b.astype(jnp.float32)
    return ref.reshape(N, H * W * num_anchors, 2)


if __name__ == "__main__":
    key = jax.random.PRNGKey(0)
    kx, kw, kb = jax.random.split(key, 3)

    # --- Test 1: f32, single HW tile (default tile_hw) --------------------
    batch, inchannels, H, W = 2, 64, 16, 16
    num_anchors = 3
    c_out = num_anchors * 2
    x = jax.random.normal(kx, (batch, inchannels, H, W), dtype=jnp.float32)
    conv_w = jax.random.normal(kw, (c_out, inchannels, 1, 1), dtype=jnp.float32) * 0.05
    conv_b = jax.random.normal(kb, (c_out,), dtype=jnp.float32) * 0.05

    out = jax.block_until_ready(class_head_forward(x, conv_w, conv_b, num_anchors))
    ref = _reference(x, conv_w, conv_b, num_anchors)
    assert out.shape == (batch, H * W * num_anchors, 2), out.shape
    assert jnp.allclose(out, ref, atol=1e-4, rtol=1e-4), "f32 mismatch vs reference"

    # --- Test 2: f32, ragged HW tiling (20x20 level, N=1, 4 HW tiles) ------
    x2 = jax.random.normal(kx, (1, inchannels, 20, 20), dtype=jnp.float32)
    out2 = jax.block_until_ready(
        class_head_forward(x2, conv_w, conv_b, num_anchors, tile_hw=128))
    ref2 = _reference(x2, conv_w, conv_b, num_anchors)
    assert out2.shape == (1, 20 * 20 * num_anchors, 2), out2.shape
    assert jnp.allclose(out2, ref2, atol=1e-4, rtol=1e-4), "ragged mismatch vs reference"

    # --- Test 3: bf16 activations/weights, f32 accumulation ----------------
    xb = x.astype(jnp.bfloat16)
    wb = conv_w.astype(jnp.bfloat16)
    out3 = jax.block_until_ready(
        class_head_forward(xb, wb, conv_b, num_anchors, tile_hw=128))
    ref3 = _reference(xb, wb, conv_b, num_anchors)   # ref from the same bf16 inputs
    assert out3.dtype == jnp.bfloat16
    assert jnp.allclose(out3.astype(jnp.float32), ref3, atol=2e-2, rtol=2e-2), \
        "bf16 mismatch vs reference"

    print("KERNEL_OK")
</pallas_src>

<mosaic_0001>
module attributes {stable_mosaic.version = 11 : i64} {
  func.func @_classhead_kernel(%arg0: i32, %arg1: i32, %arg2: memref<1x64x256xf32, #tpu.memory_space<vmem>>, %arg3: memref<6x64xf32, #tpu.memory_space<vmem>>, %arg4: memref<6x1xf32, #tpu.memory_space<vmem>>, %arg5: memref<1x6x256xf32, #tpu.memory_space<vmem>>) attributes {dimension_semantics = [#tpu.dimension_semantics<parallel>, #tpu.dimension_semantics<parallel>], iteration_bounds = array<i64: 1, 2>, scalar_prefetch = 0 : i64, scratch_operands = 0 : i64, tpu.core_type = #tpu.core_type<tc>, window_params = [{transform_indices = @transform_0, window_bounds = array<i64: 1, 64, 256>}, {pipeline_mode = #tpu.pipeline_mode<synchronous>, transform_indices = @transform_1, window_bounds = array<i64: 6, 64>}, {pipeline_mode = #tpu.pipeline_mode<synchronous>, transform_indices = @transform_2, window_bounds = array<i64: 6, 1>}, {transform_indices = @transform_3, window_bounds = array<i64: 1, 6, 256>}]} {
    %c0 = arith.constant 0 : index
    %c0_0 = arith.constant 0 : index
    %0 = vector.load %arg3[%c0, %c0_0] : memref<6x64xf32, #tpu.memory_space<vmem>>, vector<6x64xf32>
    %c0_1 = arith.constant 0 : index
    %c0_2 = arith.constant 0 : index
    %c0_3 = arith.constant 0 : index
    %1 = vector.load %arg2[%c0_1, %c0_2, %c0_3] : memref<1x64x256xf32, #tpu.memory_space<vmem>>, vector<1x64x256xf32>
    %2 = vector.shape_cast %1 : vector<1x64x256xf32> to vector<64x256xf32>
    %cst = arith.constant dense<0.000000e+00> : vector<6x256xf32>
    %3 = tpu.matmul %0, %2, %cst {dimension_numbers = #tpu.dot_dimension_numbers<[1], [0], [0], [1], [0, 0, 1, 1], [], []>} : vector<6x64xf32>, vector<64x256xf32>, vector<6x256xf32> -> vector<6x256xf32>
    %c0_4 = arith.constant 0 : index
    %c0_5 = arith.constant 0 : index
    %4 = vector.load %arg4[%c0_4, %c0_5] : memref<6x1xf32, #tpu.memory_space<vmem>>, vector<6x1xf32>
    %5 = vector.broadcast %4 : vector<6x1xf32> to vector<6x256xf32>
    %6 = arith.addf %3, %5 : vector<6x256xf32>
    %c0_6 = arith.constant 0 : index
    %c0_7 = arith.constant 0 : index
    %c0_8 = arith.constant 0 : index
    %7 = vector.load %arg5[%c0_6, %c0_7, %c0_8] : memref<1x6x256xf32, #tpu.memory_space<vmem>>, vector<1x6x256xf32>
    %8 = vector.shape_cast %7 : vector<1x6x256xf32> to vector<6x256xf32>
    %9 = vector.shape_cast %6 : vector<6x256xf32> to vector<1x6x256xf32>
    tpu.vector_store %arg5[%c0_6, %c0_7, %c0_8], %9 {strides = array<i32>} : memref<1x6x256xf32, #tpu.memory_space<vmem>>, vector<1x6x256xf32>,
    return
  }
  func.func @transform_0(%arg0: i32, %arg1: i32) -> (i32, i32, i32) {
    %c0_i32 = arith.constant 0 : i32
    %c0_i32_0 = arith.constant 0 : i32
    return %arg1, %c0_i32, %arg0 : i32, i32, i32
  }
  func.func @transform_1(%arg0: i32, %arg1: i32) -> (i32, i32) {
    %c0_i32 = arith.constant 0 : i32
    %c0_i32_0 = arith.constant 0 : i32
    %c0_i32_1 = arith.constant 0 : i32
    return %c0_i32, %c0_i32_0 : i32, i32
  }
  func.func @transform_2(%arg0: i32, %arg1: i32) -> (i32, i32) {
    %c0_i32 = arith.constant 0 : i32
    %c0_i32_0 = arith.constant 0 : i32
    %c0_i32_1 = arith.constant 0 : i32
    return %c0_i32, %c0_i32_0 : i32, i32
  }
  func.func @transform_3(%arg0: i32, %arg1: i32) -> (i32, i32, i32) {
    %c0_i32 = arith.constant 0 : i32
    %c0_i32_0 = arith.constant 0 : i32
    return %arg1, %c0_i32, %arg0 : i32, i32, i32
  }
}

</mosaic_0001>

<bundles_post_ra>
// kernel: tpu_custom_call.1
= control target key start
LH: loop header
LB: loop body
LE: loop exit
PB: predicated region body
PF: predicated region fallthrough
CT: control target
= control target key end

     0   :  { %8 = vsyncpa [#allocation3], 0  ;;  %s761_s0 = inlined_call_operand.hbm [shape: f32[2,64,256], index: 0, kind: input, shape index: {}]   ;;  %s762_s1 = inlined_call_operand.vmem [shape: f32[6,64], index: 1, kind: input, shape index: {}]   ;;  %s763_s2 = inlined_call_operand.vmem [shape: f32[6,1], index: 2, kind: input, shape index: {}]   ;;  %s764_s3 = inlined_call_operand.vmem [shape: f32[2,6,256], index: 3, kind: output, shape index: {}]  }
   0x1   :  { %10 = vsyncpa [#allocation3 + $0x1], 0  ;;  %s613_s12 = smov 0   ;;  %s615_s13 = smov 0  }
   0x2   :  { %s617_s14 = smov 0   ;;  %s619_s15 = smov 0  }
   0x3   :  { %s621_s16 = smov 0   ;;  %s623_s17 = smov 0  }
   0x4 LB: > { %s414_s18 = sadd.s32 4294967295, %s586_s17   ;;  %s25_s19 = sadd.s32 1, %s582_s16  ;;  %s586_s17 = sphi %s623_s17, %s16_s17   ;;  %s582_s16 = sphi %s621_s16, %s772_s16   ;;  %s578_s15 = sphi %s619_s15, %s771_s15   ;;  %s574_s14 = sphi %s617_s14, %s770_s14   ;;  %s570_s13 = sphi %s615_s13, %s769_s13   ;;  %s566_s12 = sphi %s613_s12, %s768_s12  }
   0x5   : > { %p26_p0 = scmp.ge.s32.totalorder %s25_s19, 2  ;;  %s37_s20 = sadd.s32 1, %s574_s14 }
   0x6   : > { %p44_p1 = scmp.ne.s32.totalorder %s574_s14, %s570_s13  ;;  %p45_p2 = scmp.eq.s32.totalorder %s586_s17, 0 }
   0x7   : > { %s774_s19 = smov (%p26_p0, %s25_s19), 0  ;;  %p50_p4 = scmp.ne.s32.totalorder %s570_s13, %s566_s12 }
   0x8   : > { %p649_p3 = por %p45_p2, %p44_p1  ;;  %s32_s22 = ssub.s32 %s582_s16, %s774_s19 }
   0x9   : > { %p51_p5 = scmp.eq.s32.totalorder %s414_s18, 0  ;;  %p35_p6 = scmp.eq.s32.totalorder %s32_s22, 0 }
   0xa   : > { %p452_p8 = scmp.lt.s32.totalorder %s586_s17, 2  ;;  %s150_s25 = sand.u32 1, %s574_s14  }
   0xb   : > { %p656_p7 = por %p51_p5, %p50_p4  ;;  %s428_s26 = sshll.u32 %s582_s16, 11 }
   0xc   : > { %s662_s24 = scalar_select %p35_p6, %s574_s14, %s37_s20  }
   0xd   : > { %s418_s27 = sshll.u32 %s150_s25, 7  ;;  %s669_s30 = scalar_lea.hbm %s761_s0, %s428_s26 }
   0xe   : > { %s154_s4 = scalar_lea.vmem [#allocation2], %s418_s27  ;;  %p673_p9 = pnand %p452_p8, %p649_p3 }
   0xf   : > { %s163_s5 = sshll.u32 %s154_s4, 4  ;;  %s679_s7 = scalar_lea.sflag [#allocation3], %s150_s25  ;;  %s677_s5 = int_to_ptr.vmem [resolvable:$true] %s163_s5 }
  0x10   : > { %s506_s8 = scalar_lea.hbm %s669_s30, 2048  ;;  %p508_p11 = pneg %p673_p9 }
  0x11   : > { %p507_p10 = scmp.ne.s32.totalorder %s669_s30, %s506_s8  ;;  %s511_s11 = scalar_lea.hbm %s761_s0, 4096 }
  0x12   : > { %p512_p0 = scmp.lt.u32.totalorder %s669_s30, %s761_s0  ;;  %p513_p1 = scmp.lt.u32.totalorder %s511_s11, %s506_s8 }
  0x13   : > { %p509_p12 = pnand %p508_p11, %p507_p10  ;;  %p515_p3 = scmp.lt.u32.totalorder %s506_s8, %s669_s30 }
  0x14   : > { %p514_p2 = por %p513_p1, %p512_p0 }
  0x15   : > { %p510_p13 = pneg %p509_p12 }
  0x16   : > { %p516_p4 = por %p515_p3, %p514_p2 }
  0x18   : > { %p517_p5 = pnand %p516_p4, %p510_p13 }
  0x1a   : > { %520 = shalt.err (!%p517_p5)
}
  0x1b   : > { %s521_s20 = scalar_lea.vmem %s677_s5, 2048  ;;  %s588_s21 = smov [#allocation2]  }
  0x1c   : > { %p522_p6 = scmp.ne.s32.totalorder %s677_s5, %s521_s20  ;;  %s526_s22 = sshll.u32 %s588_s21, 4  ;;  %s527_s22 = int_to_ptr.vmem [resolvable:$false] %s526_s22 }
  0x1d   : > { %s528_s25 = scalar_lea.vmem %s527_s22, 4096  ;;  %p529_p12 = scmp.lt.s32.totalorder %s677_s5, %s527_s22 }
  0x1e   : > { %p524_p8 = pnand %p522_p6, %p508_p11  ;;  %p530_p0 = scmp.lt.s32.totalorder %s528_s25, %s521_s20 }
  0x20   : > { %p525_p10 = pneg %p524_p8  ;;  %p531_p1 = por %p530_p0, %p529_p12 }
  0x22   : > { %p532_p2 = pnand %p531_p1, %p525_p10 }
  0x24   : > { %535 = shalt.err (!%p532_p2)
}
  0x25   : > { %s589_s26 = smov 256   ;;  %s590_s27 = smov 16  }
  0x26   : > { %451 = dma.hbm_to_vmem [thread:$0]  (!%p673_p9), %s669_s30, 2048, %s677_s5, %s679_s7, %s589_s26, %s589_s26, %s590_s27  }
  0x27   : > { %p421_p11 = scmp.ge.s32.totalorder %s586_s17, 1  ;;  %p171_p13 = scmp.lt.s32.totalorder %s586_s17, 3 }
  0x29   : > { %p172_p3 = pnand %p421_p11, %p171_p13 }
  0x2a   : > { %s177_s28 = sand.u32 (!%p172_p3), 1, %s570_s13  }
  0x2b   : > { %175 = sbr.rel (%p172_p3) target bundleno = 286 (0x11e), region = 32  ;;  %s422_s29 = sshll.u32 (!%p172_p3), %s177_s28, 7 }
  0x2c   : > { %s178_s4 = scalar_lea.sflag (!%p172_p3), [#allocation3], %s177_s28  ;;  %s710_s8 = scalar_lea.vmem (!%p172_p3), [#allocation2], %s422_s29 }
  0x32   : > { %561 = dma.done.wait (%p656_p7), %s178_s4, 2048  }
  0x33   : > { %563 = vsyncadd (%p656_p7), %s178_s4, 4294965248  ;;  %v591_v0 = vmov 0.0   ;;  %v592_v1 = vmov 0   ;;  %v221_v2 = vld [vmem:[%s710_s8 + $0x8] sm:$0xff]  ;;  %v223_v3 = vld [vmem:[%s710_s8 + $0x18] sm:$0xff]  ;;  %vm242_vm0 = vcmask 523264  }
  0x34   : > { %310 = vmatprep.mubr.f32.mxu0 %v591_v0  ;;  %505 = vset.pattern.permute.xlu0 %v592_v1  ;;  %v220_v4 = vld [vmem:[%s710_s8] sm:$0xff]  ;;  %v430_v5 = vpack.c.bf16 %v223_v3, %v221_v2  ;;  %v222_v6 = vld [vmem:[%s710_s8 + $0x10] sm:$0xff]  ;;  %v225_v7 = vld [vmem:[%s710_s8 + $0x28] sm:$0xff]  ;;  %p210_p7 = scmp.lt.s32.totalorder %s578_s15, 1 }
  0x35   : > { %v227_v8 = vld [vmem:[%s710_s8 + $0x38] sm:$0xff]  ;;  %v432_v9 = vpack.c.bf16 %v222_v6, %v220_v4  ;;  %v224_v11 = vld [vmem:[%s710_s8 + $0x20] sm:$0xff]  ;;  %v226_v12 = vld [vmem:[%s710_s8 + $0x30] sm:$0xff] }
  0x36   : > { %v434_v10 = vpack.c.bf16 %v227_v8, %v225_v7  ;;  %v229_v13 = vld [vmem:[%s710_s8 + $0x48] sm:$0xff]  ;;  %431 = vmatprep.subr.bf16.mxu0 %v430_v5  ;;  %v231_v14 = vld [vmem:[%s710_s8 + $0x58] sm:$0xff]  ;;  %v436_v15 = vpack.c.bf16 %v226_v12, %v224_v11  ;;  %v228_v17 = vld [vmem:[%s710_s8 + $0x40] sm:$0xff]  ;;  %s776_s15 = smov (!%p210_p7, %s578_s15), 1 }
  0x37   : > { %433 = vmatpush1.bf16.msra.mxu0 %v432_v9  ;;  %v438_v16 = vpack.c.bf16 %v231_v14, %v229_v13  ;;  %v230_v18 = vld [vmem:[%s710_s8 + $0x50] sm:$0xff]  ;;  %v236_v19 = vld [vmem:[%s763_s2] sm:$0x3f]  ;;  %v233_v20 = vld [vmem:[%s710_s8 + $0x68] sm:$0xff]  ;;  %s429_s7 = sshll.u32 %s776_s15, 4 }
  0x38   : > { %435 = vmatprep.subr.bf16.mxu0 %v434_v10  ;;  %v235_v21 = vld [vmem:[%s710_s8 + $0x78] sm:$0xff]  ;;  %239 = vperm.xlu0 %505, %v236_v19   ;;  %v440_v22 = vpack.c.bf16 %v230_v18, %v228_v17  ;;  %v232_v24 = vld [vmem:[%s710_s8 + $0x60] sm:$0xff]  ;;  %v234_v25 = vld [vmem:[%s710_s8 + $0x70] sm:$0xff]  ;;  %s217_s11 = scalar_lea.vmem %s764_s3, %s429_s7 }
  0x39   : > { %v442_v23 = vpack.c.bf16 %v235_v21, %v233_v20  ;;  %v444_v26 = vpack.c.bf16 %v234_v25, %v232_v24  ;;  %v219_v27 = vld [vmem:[%s762_s1] sm:$0x3f] }
  0x3b   : > { %437 = vmatpush1.bf16.msra.mxu0 %v436_v15 }
  0x3c   : > { %439 = vmatprep.subr.bf16.mxu0 %v438_v16 }
  0x3f   : > { %441 = vmatpush1.bf16.msra.mxu0 %v440_v22 }
  0x40   : > { %443 = vmatprep.subr.bf16.mxu0 %v442_v23 }
  0x43   : > { %445 = vmatpush1.bf16.msra.mxu0 %v444_v26 }
  0x46   : > { %425 = vmatmul.mubr.msk.f32.vlgmr.msra.gmra.mrb[0].mxu0 %vm242_vm0, %v219_v27 }
  0xb7   : > { %v240_v28 = vpop.permute.xlu0 %239 }
 0x119   : > { %v312_v29 = vpop.f32.mrb[0].mxu0 }
 0x11a   : > { %v313_v30 = vadd.f32 %v312_v29, %v240_v28  ;;  %v314_v31 = vpop.f32.mrb[1].mxu0 }
 0x11b   : > { %v315_v32 = vadd.f32 %v314_v31, %v240_v28 }
 0x11c   : > { %317 = vst [vmem:[%s217_s11] sm:$0x3f] %v313_v30 }
 0x11d   : > { %318 = vst [vmem:[%s217_s11 + $0x8] sm:$0x3f] %v315_v32 }
 0x11e PF: > { %s16_s17 = sadd.s32 1, %s586_s17   ;;  %s768_s12 = smov %s570_s13 }
 0x11f   : > { %p13_p9 = scmp.ge.s32.totalorder %s16_s17, 4   ;;  %s769_s13 = smov %s574_s14 }
 0x120   : > { %s770_s14 = smov %s662_s24  ;;  %s771_s15 = smov %s582_s16 }
 0x121   : > { %s772_s16 = smov %s774_s19  ;;  %15 = sbr.rel (!%p13_p9) target bundleno = 4 (0x4), region = 72 }
 0x128   :  { %349 = vsyncpa [#allocation3], 1 }
 0x129   :  { %351 = vsyncpa [#allocation3 + $0x1], 1 }

</bundles_post_ra>
